<compile_context>
chip_gen: v7x
topology: tpu7x:2x2x1
jax: 0.10.0
libtpu: 0.0.40
codegen_flags: <defaults>
</compile_context>

<pallas_src>
import jax
import jax.numpy as jnp
from jax import lax
from jax.experimental import pallas as pl
from jax.experimental.pallas import tpu as pltpu

LANES = 128
PAIR_LANES = 2 * LANES            # 256: one slab row holds 128 items (x0,x1 interleaved)
DEFAULT_BLOCK_ROWS = 4096         # (4096, 256) f32 x-block = 4 MiB; out block = 2 MiB
DEFAULT_PALLAS_MIN_BATCH = 2048   # below this, XLA fuses the trivial VPU expression better


def _abs_linear_kernel(b_ref, x_ref, wmat_ref, o_ref):
    # b_ref:    (1,)        SMEM scalar bias
    # x_ref:    (br, 256)   VMEM, interleaved [x0, x1, x0, x1, ...]
    # wmat_ref: (256, 128)  VMEM, deinterleave/scatter matrix with w0/w1 baked in
    # o_ref:    (br, 128)   VMEM, lane-dense output
    y = jnp.dot(
        x_ref[...],
        wmat_ref[...],
        preferred_element_type=jnp.float32,
        precision=lax.Precision.HIGHEST,      # keep f32 accuracy on the MXU
    )
    o_ref[...] = jnp.abs(y + b_ref[0]).astype(o_ref.dtype)


def model_abs1_forward(x, weight, bias, *, block_rows=DEFAULT_BLOCK_ROWS,
                       pallas_min_batch=DEFAULT_PALLAS_MIN_BATCH):
    """x: (B, 2), weight: (1, 2), bias: (1,) -> (B,)  (0-d scalar if B == 1)."""
    B = x.shape[0]
    dtype = x.dtype
    w = weight.reshape(2).astype(jnp.float32)
    b = bias.reshape(1).astype(jnp.float32)

    # ---- Small-batch fallback: launch + glue dominate; let XLA fuse it. ----
    if B < pallas_min_batch:
        y = jnp.abs(x[:, 0] * w[0] + x[:, 1] * w[1] + b[0]).astype(dtype)
        return y.reshape(()) if B == 1 else y

    # ---- Pallas path ----
    rows = -(-B // LANES)                       # ceil(B / 128)
    pad_needed = (rows * LANES != B)
    if pad_needed or rows < 8:
        # We are copying anyway (or the slab is tiny): make the sublane dim a
        # multiple of 8 so every block / matmul shape is tiling-friendly.
        rows = max(-(-rows // 8) * 8, 8)
    padded_B = rows * LANES
    pad = padded_B - B

    # Interleaved lane-dense slab: free reshape when pad == 0, one fused pad otherwise.
    if pad == 0:
        x_slab = x.reshape(rows, PAIR_LANES)
    else:
        x_slab = jnp.pad(x, ((0, pad), (0, 0))).reshape(rows, PAIR_LANES)

    if rows <= block_rows:
        br = rows                               # single full-extent block
    else:
        br = block_rows                         # multiple of 8; ragged last block is masked
    grid_rows = -(-rows // br)

    # Deinterleave-and-scale matrix: Wmat[2m, m] = w0, Wmat[2m+1, m] = w1.
    # Replaces the old wrapper-side x0/x1 plane split (which doubled HBM traffic);
    # the MXU applies it essentially for free under the input DMA.
    eye = jnp.eye(LANES, dtype=jnp.float32)
    wmat = jnp.stack([w[0] * eye, w[1] * eye], axis=1).reshape(PAIR_LANES, LANES)
    wmat = wmat.astype(dtype)

    out = pl.pallas_call(
        _abs_linear_kernel,
        out_shape=jax.ShapeDtypeStruct((rows, LANES), dtype),
        grid=(grid_rows,),
        in_specs=[
            pl.BlockSpec(memory_space=pltpu.SMEM),                 # bias (1,) scalar path
            pl.BlockSpec((br, PAIR_LANES), lambda i: (i, 0)),      # interleaved x slab
            pl.BlockSpec((PAIR_LANES, LANES), lambda i: (0, 0)),   # wmat, stays resident
        ],
        out_specs=pl.BlockSpec((br, LANES), lambda i: (i, 0)),
        compiler_params=pltpu.CompilerParams(
            dimension_semantics=("parallel",),                     # megacore-shardable
            vmem_limit_bytes=32 * 1024 * 1024,
        ),
    )(b, x_slab, wmat)

    y = out.reshape(-1)                         # free (contiguous)
    if pad != 0:
        y = y[:B]                               # only the unaligned path pays this slice
    if B == 1:
        return y.reshape(())                    # torch .squeeze() of (1,1) -> scalar
    return y


if __name__ == "__main__":
    key = jax.random.PRNGKey(0)
    k_w, k_x1, k_x2, k_x3 = jax.random.split(key, 4)

    # Deterministic param init mirroring __init__:
    #   kaiming_normal_(weight, nonlinearity='relu') -> std = sqrt(2 / fan_in) = 1.0
    #   zeros_(bias)
    fan_in = 2
    std = (2.0 / fan_in) ** 0.5
    weight = std * jax.random.normal(k_w, (1, 2), dtype=jnp.float32)   # (out=1, in=2)
    bias = jnp.zeros((1,), dtype=jnp.float32)

    def ref_fn(x):
        return jnp.abs(x @ weight.T + bias).squeeze(-1)

    # 1) Aligned batch (B % 1024 == 0): zero-copy slab path, forced through the kernel.
    x_a = jax.random.normal(k_x1, (1024, 2), dtype=jnp.float32)
    y_a = model_abs1_forward(x_a, weight, bias, pallas_min_batch=0)
    jax.block_until_ready(y_a)
    assert y_a.shape == (1024,)
    assert jnp.allclose(y_a, ref_fn(x_a), atol=1e-4, rtol=1e-4)

    # 2) Unaligned batch: exercises the fused pad + masked/sliced tail path.
    x_b = jax.random.normal(k_x2, (2000, 2), dtype=jnp.float32)
    y_b = model_abs1_forward(x_b, weight, bias, pallas_min_batch=0)
    jax.block_until_ready(y_b)
    assert y_b.shape == (2000,)
    assert jnp.allclose(y_b, ref_fn(x_b), atol=1e-4, rtol=1e-4)

    # 3) Tiny batch: forced kernel path (rows rounded up to 8) ...
    x_c = jax.random.normal(k_x3, (8, 2), dtype=jnp.float32)
    y_c = model_abs1_forward(x_c, weight, bias, pallas_min_batch=0)
    jax.block_until_ready(y_c)
    assert y_c.shape == (8,)
    assert jnp.allclose(y_c, ref_fn(x_c), atol=1e-4, rtol=1e-4)

    #    ... and the default small-batch XLA fallback (perf-review item #7).
    y_d = model_abs1_forward(x_c, weight, bias)
    jax.block_until_ready(y_d)
    assert jnp.allclose(y_d, ref_fn(x_c), atol=1e-4, rtol=1e-4)

    print("KERNEL_OK")
</pallas_src>

<mosaic_0001>
module attributes {stable_mosaic.version = 11 : i64} {
  func.func @_abs_linear_kernel(%arg0: i32, %arg1: memref<1xf32, #tpu.memory_space<smem>>, %arg2: memref<8x256xf32, #tpu.memory_space<vmem>>, %arg3: memref<256x128xf32, #tpu.memory_space<vmem>>, %arg4: memref<8x128xf32, #tpu.memory_space<vmem>>) attributes {dimension_semantics = [#tpu.dimension_semantics<parallel>], iteration_bounds = array<i64: 1>, scalar_prefetch = 0 : i64, scratch_operands = 0 : i64, tpu.core_type = #tpu.core_type<tc>, window_params = [{transform_indices = @transform_0, window_bounds = array<i64: 1>}, {transform_indices = @transform_1, window_bounds = array<i64: 8, 256>}, {pipeline_mode = #tpu.pipeline_mode<synchronous>, transform_indices = @transform_2, window_bounds = array<i64: 256, 128>}, {transform_indices = @transform_3, window_bounds = array<i64: 8, 128>}]} {
    %c0 = arith.constant 0 : index
    %c0_0 = arith.constant 0 : index
    %0 = vector.load %arg2[%c0, %c0_0] : memref<8x256xf32, #tpu.memory_space<vmem>>, vector<8x256xf32>
    %c0_1 = arith.constant 0 : index
    %c0_2 = arith.constant 0 : index
    %1 = vector.load %arg3[%c0_1, %c0_2] : memref<256x128xf32, #tpu.memory_space<vmem>>, vector<256x128xf32>
    %cst = arith.constant dense<0.000000e+00> : vector<8x128xf32>
    %2 = tpu.matmul %0, %1, %cst {dimension_numbers = #tpu.dot_dimension_numbers<[1], [0], [0], [1], [0, 0, 1, 1], [], []>, precision = #tpu.contract_precision<fp32>} : vector<8x256xf32>, vector<256x128xf32>, vector<8x128xf32> -> vector<8x128xf32>
    %c0_3 = arith.constant 0 : index
    %3 = memref.load %arg1[%c0_3] : memref<1xf32, #tpu.memory_space<smem>>
    %4 = vector.broadcast %3 : f32 to vector<8x128xf32>
    %5 = arith.addf %2, %4 : vector<8x128xf32>
    %6 = math.absf %5 : vector<8x128xf32>
    %c0_4 = arith.constant 0 : index
    %c0_5 = arith.constant 0 : index
    %7 = vector.load %arg4[%c0_4, %c0_5] : memref<8x128xf32, #tpu.memory_space<vmem>>, vector<8x128xf32>
    tpu.vector_store %arg4[%c0_4, %c0_5], %6 {strides = array<i32>} : memref<8x128xf32, #tpu.memory_space<vmem>>, vector<8x128xf32>,
    return
  }
  func.func @transform_0(%arg0: i32) -> i32 {
    %c0_i32 = arith.constant 0 : i32
    %c0_i32_0 = arith.constant 0 : i32
    return %c0_i32 : i32
  }
  func.func @transform_1(%arg0: i32) -> (i32, i32) {
    %c0_i32 = arith.constant 0 : i32
    %c0_i32_0 = arith.constant 0 : i32
    return %arg0, %c0_i32 : i32, i32
  }
  func.func @transform_2(%arg0: i32) -> (i32, i32) {
    %c0_i32 = arith.constant 0 : i32
    %c0_i32_0 = arith.constant 0 : i32
    %c0_i32_1 = arith.constant 0 : i32
    return %c0_i32, %c0_i32_0 : i32, i32
  }
  func.func @transform_3(%arg0: i32) -> (i32, i32) {
    %c0_i32 = arith.constant 0 : i32
    %c0_i32_0 = arith.constant 0 : i32
    return %arg0, %c0_i32 : i32, i32
  }
}

</mosaic_0001>

<bundles_post_ra>
// kernel: tpu_custom_call.1
= control target key start
LH: loop header
LB: loop body
LE: loop exit
PB: predicated region body
PF: predicated region fallthrough
CT: control target
= control target key end

     0   :  { %9 = vsyncpa [#allocation4], 0  ;;  %s1906_s0 = inlined_call_operand.<no memory space> [shape: f32[1], index: 0, kind: input, shape index: {}]   ;;  %s1907_s1 = inlined_call_operand.hbm [shape: f32[8,256], index: 1, kind: input, shape index: {}]   ;;  %s1908_s2 = inlined_call_operand.hbm [shape: f32[256,128], index: 2, kind: input, shape index: {}]   ;;  %s1909_s3 = inlined_call_operand.hbm [shape: f32[8,128], index: 3, kind: output, shape index: {}]  }
   0x1   :  { %10 = vsyncpa [#allocation7], 0 }
   0x2   :  { %11 = vsyncpa [#allocation5], 0  ;;  %s1437_s12 = smov [#allocation3]   ;;  %s1438_s14 = smov [#allocation6]  }
   0x3   :  { %s20_s13 = sshll.u32 %s1437_s12, 4  ;;  %s29_s15 = sshll.u32 %s1438_s14, 4  ;;  %s21_s13 = int_to_ptr.vmem [resolvable:$true] %s20_s13  ;;  %s1462_s15 = int_to_ptr.vmem [resolvable:$true] %s29_s15 }
   0x4   :  { %s1365_s18 = scalar_lea.hbm %s1907_s1, 256 }
   0x5   :  { %p1366_p0 = scmp.ne.s32.totalorder %s1907_s1, %s1365_s18  ;;  %p1369_p1 = scmp.lt.u32.totalorder %s1365_s18, %s1907_s1 }
   0x7   :  { %p1371_p2 = pnand %p1369_p1, %p1366_p0 }
   0x9   :  { %1374 = shalt.err (!%p1371_p2)
}
   0xa   :  { %s1375_s23 = scalar_lea.vmem %s21_s13, 256  ;;  %p1380_p4 = scmp.lt.s32.totalorder %s21_s13, %s21_s13 }
   0xb   :  { %p1376_p3 = scmp.ne.s32.totalorder %s21_s13, %s1375_s23  ;;  %p1381_p5 = scmp.lt.s32.totalorder %s1375_s23, %s1375_s23 }
   0xd   :  { %p1382_p6 = por %p1381_p5, %p1380_p4 }
   0xf   :  { %p1383_p7 = pnand %p1382_p6, %p1376_p3 }
  0x11   :  { %1386 = shalt.err (!%p1383_p7)
}
  0x12   :  { %23 = dma.hbm_to_vmem [thread:$0]  %s1907_s1, 256, %s21_s13, [#allocation4]  }
  0x13   :  { %s1387_s28 = scalar_lea.hbm %s1908_s2, 4096 }
  0x14   :  { %p1388_p8 = scmp.ne.s32.totalorder %s1908_s2, %s1387_s28  ;;  %p1391_p9 = scmp.lt.u32.totalorder %s1387_s28, %s1908_s2 }
  0x16   :  { %p1393_p10 = pnand %p1391_p9, %p1388_p8 }
  0x18   :  { %1396 = shalt.err (!%p1393_p10)
}
  0x19   :  { %s1397_s6 = scalar_lea.vmem %s1462_s15, 4096  ;;  %p1402_p12 = scmp.lt.s32.totalorder %s1462_s15, %s1462_s15 }
  0x1a   :  { %p1398_p11 = scmp.ne.s32.totalorder %s1462_s15, %s1397_s6  ;;  %p1403_p13 = scmp.lt.s32.totalorder %s1397_s6, %s1397_s6 }
  0x1c   :  { %p1404_p0 = por %p1403_p13, %p1402_p12 }
  0x1e   :  { %p1405_p1 = pnand %p1404_p0, %p1398_p11 }
  0x20   :  { %1408 = shalt.err (!%p1405_p1)
}
  0x21   :  { %s1439_s1 = smov 128   ;;  %s1440_s7 = smov 8  }
  0x22   :  { %35 = dma.hbm_to_vmem [thread:$0]  %s1908_s2, 4096, %s1462_s15, [#allocation7], %s1439_s1, %s1439_s1, %s1440_s7  }
  0x23   :  { %1431 = dma.done.wait [#allocation4], 256  }
  0x24   :  { %1432 = vsyncadd [#allocation4], 4294967040 }
  0x25   :  { %1433 = dma.done.wait [#allocation7], 4096  }
  0x26   :  { %1434 = vsyncadd [#allocation7], 4294963200  ;;  %v60_v0 = vld [vmem:[#allocation6 + $0x80] sm:$0xff]  ;;  %v61_v1 = vld [vmem:[#allocation6 + $0x88] sm:$0xff] }
  0x27   :  { %v44_v2 = vld [vmem:[#allocation6] sm:$0xff]  ;;  %v127_v3 = vand.u32 4294901760, %v60_v0  ;;  %v130_v4 = vand.u32 4294901760, %v61_v1  ;;  %v45_v5 = vld [vmem:[#allocation6 + $0x8] sm:$0xff]  ;;  %v62_v7 = vld [vmem:[#allocation6 + $0x90] sm:$0xff] }
  0x28   :  { %v79_v6 = vand.u32 4294901760, %v44_v2  ;;  %v63_v8 = vld [vmem:[#allocation6 + $0x98] sm:$0xff]  ;;  %v82_v9 = vand.u32 4294901760, %v45_v5  ;;  %v133_v10 = vand.u32 4294901760, %v62_v7  ;;  %v46_v12 = vld [vmem:[#allocation6 + $0x10] sm:$0xff]  ;;  %v64_v18 = vld [vmem:[#allocation6 + $0xa0] sm:$0xff] }
  0x29   :  { %v136_v11 = vand.u32 4294901760, %v63_v8  ;;  %v47_v13 = vld [vmem:[#allocation6 + $0x18] sm:$0xff]  ;;  %v1493_v14 = vpack.c.bf16 %v130_v4, %v127_v3  ;;  %v85_v16 = vand.u32 4294901760, %v46_v12  ;;  %v65_v19 = vld [vmem:[#allocation6 + $0xa8] sm:$0xff]  ;;  %v48_v23 = vld [vmem:[#allocation6 + $0x20] sm:$0xff]  ;;  %v139_v29 = vand.u32 4294901760, %v64_v18 }
  0x2a   :  { %v1495_v15 = vsub.f32 %v44_v2, %v79_v6  ;;  %v88_v17 = vand.u32 4294901760, %v47_v13  ;;  %v1497_v20 = vpack.c.bf16 %v82_v9, %v79_v6  ;;  %v1499_v21 = vsub.f32 %v45_v5, %v82_v9  ;;  %v49_v24 = vld [vmem:[#allocation6 + $0x28] sm:$0xff]  ;;  %v66_v37 = vld [vmem:[#allocation6 + $0xb0] sm:$0xff]  ;;  %v67_v42 = vld [vmem:[#allocation6 + $0xb8] sm:$0xff] }
  0x2b   :  { %v1501_v22 = vpack.c.bf16 %v136_v11, %v133_v10  ;;  %1169 = vmatprep.subr.bf16.mxu0 %v1493_v14  ;;  %v1504_v25 = vsub.f32 %v62_v7, %v133_v10  ;;  %v1506_v26 = vsub.f32 %v63_v8, %v136_v11  ;;  %v1510_v28 = vsub.f32 %v46_v12, %v85_v16  ;;  %v50_v55 = vld [vmem:[#allocation6 + $0x30] sm:$0xff]  ;;  %v51_v56 = vld [vmem:[#allocation6 + $0x38] sm:$0xff]  ;;  %v68_v5 = vld [vmem:[#allocation6 + $0xc0] sm:$0xff] }
  0x2c   :  { %v1508_v27 = vpack.c.bf16 %v88_v17, %v85_v16  ;;  %1171 = vmatpush3.bf16.msra.mxu0 %v1497_v20  ;;  %v142_v30 = vand.u32 4294901760, %v65_v19  ;;  %v1513_v31 = vsub.f32 %v60_v0, %v127_v3  ;;  %v1515_v32 = vsub.f32 %v61_v1, %v130_v4  ;;  %v69_v6 = vld [vmem:[#allocation6 + $0xc8] sm:$0xff]  ;;  %v52_v11 = vld [vmem:[#allocation6 + $0x40] sm:$0xff] }
  0x2d   :  { %1173 = vmatprep.subr.bf16.mxu0 %v1501_v22  ;;  %v91_v33 = vand.u32 4294901760, %v48_v23  ;;  %v94_v34 = vand.u32 4294901760, %v49_v24  ;;  %v1925_v35 = vand.u32 4294901760, %v1495_v15  ;;  %v1924_v36 = vand.u32 4294901760, %v1499_v21 }
  0x2e   :  { %v1520_v38 = vsub.f32 %v47_v13, %v88_v17  ;;  %v1522_v39 = vpack.c.bf16 %v142_v30, %v139_v29  ;;  %v1524_v40 = vsub.f32 %v64_v18, %v139_v29  ;;  %v1929_v41 = vand.u32 4294901760, %v1513_v31  ;;  %v53_v29 = vld [vmem:[#allocation6 + $0x48] sm:$0xff] }
  0x2f   :  { %v1527_v43 = vsub.f32 %v65_v19, %v142_v30  ;;  %v1927_v44 = vand.u32 4294901760, %v1515_v32  ;;  %v1530_v45 = vpack.c.bf16 %v94_v34, %v91_v33  ;;  %v1532_v46 = vsub.f32 %v48_v23, %v91_v33 }
  0x30   :  { %1175 = vmatpush3.bf16.msra.mxu0 %v1508_v27  ;;  %v306_v47 = vsub.f32 %v1513_v31, %v1929_v41  ;;  %v194_v48 = vsub.f32 %v1495_v15, %v1925_v35  ;;  %v201_v49 = vsub.f32 %v1499_v21, %v1924_v36  ;;  %v145_v50 = vand.u32 4294901760, %v66_v37  ;;  %v43_v41 = vld [vmem:[#allocation3 + $0x8] sm:$0xff] }
  0x31   :  { %1177 = vmatprep.subr.bf16.mxu0 %v1522_v39  ;;  %v313_v51 = vsub.f32 %v1515_v32, %v1927_v44  ;;  %v148_v52 = vand.u32 4294901760, %v67_v42  ;;  %v1922_v53 = vand.u32 4294901760, %v1504_v25  ;;  %v1920_v54 = vand.u32 4294901760, %v1506_v26 }
  0x32   :  { %v307_v57 = vand.u32 4294901760, %v306_v47  ;;  %v1550_v58 = vsub.f32 %v49_v24, %v94_v34  ;;  %v195_v59 = vand.u32 4294901760, %v194_v48  ;;  %v202_v60 = vand.u32 4294901760, %v201_v49 }
  0x33   :  { %v314_v61 = vand.u32 4294901760, %v313_v51  ;;  %v1552_v62 = vpack.c.bf16 %v148_v52, %v145_v50  ;;  %v1554_v63 = vsub.f32 %v66_v37, %v145_v50  ;;  %v320_v0 = vsub.f32 %v1504_v25, %v1922_v53 }
  0x34   :  { %1179 = vmatpush3.bf16.msra.mxu0 %v1530_v45  ;;  %v1202_v1 = vpack.c.bf16 %v202_v60, %v195_v59  ;;  %v327_v2 = vsub.f32 %v1506_v26, %v1920_v54  ;;  %v97_v3 = vand.u32 4294901760, %v50_v55  ;;  %v100_v4 = vand.u32 4294901760, %v51_v56  ;;  %v71_v59 = vld [vmem:[#allocation6 + $0xd8] sm:$0xff] }
  0x35   :  { %v1200_v7 = vpack.c.bf16 %v314_v61, %v307_v57  ;;  %1181 = vmatprep.subr.bf16.mxu0 %v1552_v62  ;;  %v321_v8 = vand.u32 4294901760, %v320_v0  ;;  %v1919_v9 = vand.u32 4294901760, %v1510_v28  ;;  %v1917_v10 = vand.u32 4294901760, %v1520_v38  ;;  %v70_v57 = vld [vmem:[#allocation6 + $0xd0] sm:$0xff]  ;;  %v75_v54 = vld [vmem:[#allocation6 + $0xf8] sm:$0xff] }
  0x36   :  { %v1566_v12 = vsub.f32 %v67_v42, %v148_v52  ;;  %v328_v13 = vand.u32 4294901760, %v327_v2  ;;  %v1568_v16 = vpack.c.bf16 %v100_v4, %v97_v3  ;;  %v1570_v17 = vsub.f32 %v50_v55, %v97_v3 }
  0x37   :  { %1201 = vmatprep.subr.bf16.mxu1 %v1200_v7  ;;  %v208_v18 = vsub.f32 %v1510_v28, %v1919_v9  ;;  %v215_v19 = vsub.f32 %v1520_v38, %v1917_v10  ;;  %v151_v23 = vand.u32 4294901760, %v68_v5  ;;  %v154_v24 = vand.u32 4294901760, %v69_v6  ;;  %v74_v9 = vld [vmem:[#allocation6 + $0xf0] sm:$0xff] }
  0x38   :  { %1203 = vmatpush3.bf16.msra.mxu1 %v1202_v1  ;;  %v1204_v30 = vpack.c.bf16 %v328_v13, %v321_v8  ;;  %1183 = vmatpush3.bf16.msra.mxu0 %v1568_v16  ;;  %v1915_v33 = vand.u32 4294901760, %v1524_v40  ;;  %v1914_v34 = vand.u32 4294901760, %v1527_v43  ;;  %v103_v37 = vand.u32 4294901760, %v52_v11  ;;  %v54_v1 = vld [vmem:[#allocation6 + $0x50] sm:$0xff] }
  0x39   :  { %v1581_v42 = vsub.f32 %v51_v56, %v100_v4  ;;  %v209_v47 = vand.u32 4294901760, %v208_v18  ;;  %v216_v48 = vand.u32 4294901760, %v215_v19  ;;  %v1583_v49 = vpack.c.bf16 %v154_v24, %v151_v23  ;;  %v55_v18 = vld [vmem:[#allocation6 + $0x58] sm:$0xff] }
  0x3a   :  { %1205 = vmatprep.subr.bf16.mxu1 %v1204_v30  ;;  %v1585_v50 = vsub.f32 %v68_v5, %v151_v23  ;;  %v334_v51 = vsub.f32 %v1524_v40, %v1915_v33  ;;  %v341_v52 = vsub.f32 %v1527_v43, %v1914_v34  ;;  %v106_v55 = vand.u32 4294901760, %v53_v29 }
  0x3b   :  { %v1206_v56 = vpack.c.bf16 %v216_v48, %v209_v47  ;;  %1185 = vmatprep.subr.bf16.mxu0 %v1583_v49  ;;  %v1594_v60 = vsub.f32 %v69_v6, %v154_v24  ;;  %v1912_v61 = vand.u32 4294901760, %v1532_v46  ;;  %v1910_v0 = vand.u32 4294901760, %v1550_v58 }
  0x3c   :  { %v335_v2 = vand.u32 4294901760, %v334_v51  ;;  %v342_v3 = vand.u32 4294901760, %v341_v52  ;;  %v1598_v4 = vpack.c.bf16 %v106_v55, %v103_v37  ;;  %v1600_v5 = vsub.f32 %v52_v11, %v103_v37 }
  0x3d   :  { %1207 = vmatpush3.bf16.msra.mxu1 %v1206_v56  ;;  %v222_v7 = vsub.f32 %v1532_v46, %v1912_v61  ;;  %v229_v6 = vsub.f32 %v1550_v58, %v1910_v0  ;;  %v157_v8 = vand.u32 4294901760, %v70_v57  ;;  %v160_v13 = vand.u32 4294901760, %v71_v59  ;;  %v73_v0 = vld [vmem:[#allocation6 + $0xe8] sm:$0xff] }
  0x3e   :  { %v1208_v19 = vpack.c.bf16 %v342_v3, %v335_v2  ;;  %1187 = vmatpush3.bf16.msra.mxu0 %v1598_v4  ;;  %v1911_v23 = vand.u32 4294901760, %v1554_v63  ;;  %v1913_v11 = vand.u32 4294901760, %v1566_v12  ;;  %v109_v24 = vand.u32 4294901760, %v54_v1  ;;  %v72_v3 = vld [vmem:[#allocation6 + $0xe0] sm:$0xff] }
  0x3f   :  { %v1611_v30 = vsub.f32 %v53_v29, %v106_v55  ;;  %v223_v37 = vand.u32 4294901760, %v222_v7  ;;  %v230_v47 = vand.u32 4294901760, %v229_v6  ;;  %v1613_v48 = vpack.c.bf16 %v160_v13, %v157_v8  ;;  %v56_v6 = vld [vmem:[#allocation6 + $0x60] sm:$0xff] }
  0x40   :  { %1209 = vmatprep.subr.bf16.mxu1 %v1208_v19  ;;  %v1615_v51 = vsub.f32 %v70_v57, %v157_v8  ;;  %v348_v52 = vsub.f32 %v1554_v63, %v1911_v23  ;;  %v355_v56 = vsub.f32 %v1566_v12, %v1913_v11  ;;  %v112_v2 = vand.u32 4294901760, %v55_v18  ;;  %v57_v11 = vld [vmem:[#allocation6 + $0x68] sm:$0xff] }
  0x41   :  { %v1210_v29 = vpack.c.bf16 %v230_v47, %v223_v37  ;;  %1189 = vmatprep.subr.bf16.mxu0 %v1613_v48  ;;  %v1624_v55 = vsub.f32 %v71_v59, %v160_v13  ;;  %v1916_v7 = vand.u32 4294901760, %v1570_v17  ;;  %v1918_v57 = vand.u32 4294901760, %v1581_v42 }
  0x42   :  { %v349_v8 = vand.u32 4294901760, %v348_v52  ;;  %v356_v19 = vand.u32 4294901760, %v355_v56  ;;  %v1628_v23 = vpack.c.bf16 %v112_v2, %v109_v24  ;;  %v1630_v61 = vsub.f32 %v54_v1, %v109_v24 }
  0x43   :  { %1211 = vmatpush3.bf16.msra.mxu1 %v1210_v29  ;;  %v236_v37 = vsub.f32 %v1570_v17, %v1916_v7  ;;  %v243_v59 = vsub.f32 %v1581_v42, %v1918_v57  ;;  %v163_v13 = vand.u32 4294901760, %v72_v3  ;;  %v166_v47 = vand.u32 4294901760, %v73_v0 }
  0x44   :  { %1955 = vst [vmem:[#allocation12_spill] sm:$0xff] %v1628_v23  ;;  %v1212_v34 = vpack.c.bf16 %v356_v19, %v349_v8  ;;  %1191 = vmatpush3.bf16.msra.mxu0 %v1628_v23  ;;  %v1921_v52 = vand.u32 4294901760, %v1585_v50  ;;  %v1923_v1 = vand.u32 4294901760, %v1594_v60  ;;  %v115_v24 = vand.u32 4294901760, %v56_v6 }
  0x45   :  { %v1641_v56 = vsub.f32 %v55_v18, %v112_v2  ;;  %v237_v29 = vand.u32 4294901760, %v236_v37  ;;  %v244_v33 = vand.u32 4294901760, %v243_v59  ;;  %v1643_v7 = vpack.c.bf16 %v166_v47, %v163_v13  ;;  %v58_v37 = vld [vmem:[#allocation6 + $0x70] sm:$0xff] }
  0x46   :  { %1213 = vmatprep.subr.bf16.mxu1 %v1212_v34  ;;  %v1645_v10 = vsub.f32 %v72_v3, %v163_v13  ;;  %v362_v8 = vsub.f32 %v1585_v50, %v1921_v52  ;;  %v369_v19 = vsub.f32 %v1594_v60, %v1923_v1  ;;  %v118_v57 = vand.u32 4294901760, %v57_v11  ;;  %v59_v1 = vld [vmem:[#allocation6 + $0x78] sm:$0xff] }
  0x47   :  { %1956 = vst [vmem:[#allocation13_spill] sm:$0xff] %v1643_v7  ;;  %v1214_v18 = vpack.c.bf16 %v244_v33, %v237_v29  ;;  %1193 = vmatprep.subr.bf16.mxu0 %v1643_v7  ;;  %v1654_v2 = vsub.f32 %v73_v0, %v166_v47  ;;  %v1926_v34 = vand.u32 4294901760, %v1600_v5  ;;  %v1928_v3 = vand.u32 4294901760, %v1611_v30 }
  0x48   :  { %v363_v59 = vand.u32 4294901760, %v362_v8  ;;  %v370_v13 = vand.u32 4294901760, %v369_v19  ;;  %v1658_v52 = vpack.c.bf16 %v118_v57, %v115_v24  ;;  %v1660_v53 = vsub.f32 %v56_v6, %v115_v24 }
  0x49   :  { %1215 = vmatpush3.bf16.msra.mxu1 %v1214_v18  ;;  %v250_v33 = vsub.f32 %v1600_v5, %v1926_v34  ;;  %v257_v0 = vsub.f32 %v1611_v30, %v1928_v3  ;;  %v169_v47 = vand.u32 4294901760, %v74_v9  ;;  %v172_v29 = vand.u32 4294901760, %v75_v54 }
  0x4a   :  { %1957 = vst [vmem:[#allocation14_spill] sm:$0xff] %v1658_v52  ;;  %v1216_v36 = vpack.c.bf16 %v370_v13, %v363_v59  ;;  %1195 = vmatpush3.bf16.msra.mxu0 %v1658_v52  ;;  %v1932_v8 = vand.u32 4294901760, %v1615_v51  ;;  %v1933_v6 = vand.u32 4294901760, %v1624_v55  ;;  %v121_v24 = vand.u32 4294901760, %v58_v37 }
  0x4b   :  { %v1671_v19 = vsub.f32 %v57_v11, %v118_v57  ;;  %v251_v18 = vand.u32 4294901760, %v250_v33  ;;  %v258_v35 = vand.u32 4294901760, %v257_v0  ;;  %v1673_v34 = vpack.c.bf16 %v172_v29, %v169_v47 }
  0x4c   :  { %1217 = vmatprep.subr.bf16.mxu1 %v1216_v36  ;;  %v1675_v44 = vsub.f32 %v74_v9, %v169_v47  ;;  %v376_v59 = vsub.f32 %v1615_v51, %v1932_v8  ;;  %v383_v13 = vsub.f32 %v1624_v55, %v1933_v6  ;;  %v124_v3 = vand.u32 4294901760, %v59_v1  ;;  %v42_v9 = vld [vmem:[#allocation3] sm:$0xff] }
  0x4d   :  { %1958 = vst [vmem:[#allocation15_spill] sm:$0xff] %v1673_v34  ;;  %v1218_v52 = vpack.c.bf16 %v258_v35, %v251_v18  ;;  %1197 = vmatprep.subr.bf16.mxu0 %v1673_v34  ;;  %v1684_v11 = vsub.f32 %v75_v54, %v172_v29  ;;  %v1934_v57 = vand.u32 4294901760, %v1630_v61  ;;  %v1935_v36 = vand.u32 4294901760, %v1641_v56 }
  0x4e   :  { %v377_v33 = vand.u32 4294901760, %v376_v59  ;;  %v384_v0 = vand.u32 4294901760, %v383_v13  ;;  %v1688_v47 = vpack.c.bf16 %v124_v3, %v121_v24  ;;  %v1690_v8 = vsub.f32 %v58_v37, %v121_v24 }
  0x4f   :  { %1219 = vmatpush3.bf16.msra.mxu1 %v1218_v52  ;;  %v264_v35 = vsub.f32 %v1630_v61, %v1934_v57  ;;  %v271_v54 = vsub.f32 %v1641_v56, %v1935_v36  ;;  %v1698_v29 = vand.u32 4294901760, %v43_v41  ;;  %v1938_v18 = vand.u32 4294901760, %v1645_v10 }
  0x50   :  { %1959 = vst [vmem:[#allocation16_spill] sm:$0xff] %v1688_v47  ;;  %v1220_v6 = vpack.c.bf16 %v384_v0, %v377_v33  ;;  %1199 = vmatpush3.bf16.msra.mxu0 %v1688_v47  ;;  %v1944_v59 = vand.u32 4294901760, %v1654_v2  ;;  %v1232_v52 = vpack.c.bf16 %v1515_v32, %v1513_v31  ;;  %v1705_v37 = vand.u32 4294901760, %v42_v9 }
  0x51   :  { %1960 = vst [vmem:[#allocation17_spill] sm:$0xff] %v1698_v29  ;;  %v265_v24 = vand.u32 4294901760, %v264_v35  ;;  %v272_v13 = vand.u32 4294901760, %v271_v54  ;;  %v1708_v57 = vsub.f32 %v43_v41, %v1698_v29  ;;  %v390_v36 = vsub.f32 %v1645_v10, %v1938_v18  ;;  %415 = vmatprep.mubr.f32.mxu1 %v1698_v29 }
  0x52   :  { %1221 = vmatprep.subr.bf16.mxu1 %v1220_v6  ;;  %v397_v33 = vsub.f32 %v1654_v2, %v1944_v59  ;;  %1233 = vmatprep.subr.bf16.mxu0 %v1232_v52  ;;  %v1718_v0 = vsub.f32 %v42_v9, %v1705_v37  ;;  %v1943_v35 = vand.u32 4294901760, %v1660_v53  ;;  %v1945_v41 = vand.u32 4294901760, %v1671_v19 }
  0x53   :  { %v1722_v54 = vsub.f32 %v59_v1, %v124_v3  ;;  %v1222_v47 = vpack.c.bf16 %v272_v13, %v265_v24  ;;  %v1946_v18 = vand.u32 4294901760, %v1708_v57  ;;  %v391_v34 = vand.u32 4294901760, %v390_v36 }
  0x54   :  { %v398_v29 = vand.u32 4294901760, %v397_v33  ;;  %v182_v6 = vand.u32 4294901760, %v1718_v0  ;;  %v278_v52 = vsub.f32 %v1660_v53, %v1943_v35  ;;  %v285_v9 = vsub.f32 %v1671_v19, %v1945_v41 }
  0x55   :  { %1223 = vmatpush3.bf16.msra.mxu1 %v1222_v47  ;;  %v177_v1 = vsub.f32 %v1708_v57, %v1946_v18  ;;  %v1234_v3 = vpack.c.bf16 %v1499_v21, %v1495_v15  ;;  %v1951_v36 = vand.u32 4294901760, %v1675_v44  ;;  %v1954_v24 = vand.u32 4294901760, %v1684_v11 }
  0x56   :  { %v1224_v13 = vpack.c.bf16 %v398_v29, %v391_v34  ;;  %v183_v33 = vsub.f32 %v1718_v0, %v182_v6  ;;  %v279_v35 = vand.u32 4294901760, %v278_v52  ;;  %v286_v59 = vand.u32 4294901760, %v285_v9 }
  0x57   :  { %v178_v41 = vand.u32 4294901760, %v177_v1  ;;  %v404_v47 = vsub.f32 %v1675_v44, %v1951_v36  ;;  %v411_v18 = vsub.f32 %v1684_v11, %v1954_v24  ;;  %v1953_v7 = vand.u32 4294901760, %v1690_v8 }
  0x58   :  { %1225 = vmatprep.subr.bf16.mxu1 %v1224_v13  ;;  %v184_v23 = vand.u32 4294901760, %v183_v33  ;;  %v1226_v34 = vpack.c.bf16 %v286_v59, %v279_v35  ;;  %v1236_v29 = vpack.c.bf16 %v1506_v26, %v1504_v25  ;;  %v1952_v52 = vand.u32 4294901760, %v1722_v54 }
  0x59   :  { %179 = vmatprep.mubr.f32.mxu0 %v178_v41  ;;  %v405_v9 = vand.u32 4294901760, %v404_v47  ;;  %v412_v1 = vand.u32 4294901760, %v411_v18  ;;  %v292_v36 = vsub.f32 %v1690_v8, %v1953_v7  ;;  %v1238_v33 = vpack.c.bf16 %v1520_v38, %v1510_v28 }
  0x5a   :  { %185 = vmatmul.mubr.f32.vlgmr.msra.gmra.mrb[0].mxu0 %v184_v23  ;;  %1227 = vmatpush3.bf16.msra.mxu1 %v1226_v34  ;;  %v299_v13 = vsub.f32 %v1722_v54, %v1952_v52  ;;  %v1240_v41 = vpack.c.bf16 %v1527_v43, %v1524_v40  ;;  %v1242_v23 = vpack.c.bf16 %v1550_v58, %v1532_v46  ;;  %v1962_v34 = vand.u32 4294901760, %v1515_v32 }
  0x5b   :  { %1235 = vmatpush3.bf16.msra.mxu0 %v1234_v3  ;;  %v1228_v59 = vpack.c.bf16 %v412_v1, %v405_v9  ;;  %v293_v35 = vand.u32 4294901760, %v292_v36  ;;  %552 = vmatprep.mubr.f32.mxu0 %v1708_v57  ;;  %v1244_v47 = vpack.c.bf16 %v1566_v12, %v1554_v63  ;;  %v1961_v36 = vand.u32 4294901760, %v1513_v31 }
  0x5c   :  { %1237 = vmatprep.subr.bf16.mxu0 %v1236_v29  ;;  %v300_v18 = vand.u32 4294901760, %v299_v13  ;;  %v1963_v1 = vand.u32 4294901760, %v1495_v15  ;;  %v1964_v29 = vand.u32 4294901760, %v1499_v21  ;;  %v1965_v52 = vand.u32 4294901760, %v1504_v25 }
  0x5d   :  { %1229 = vmatprep.subr.bf16.mxu1 %v1228_v59  ;;  %v1296_v9 = vpack.c.bf16 %v1962_v34, %v1961_v36  ;;  %v1966_v59 = vand.u32 4294901760, %v1506_v26  ;;  %v1967_v24 = vand.u32 4294901760, %v1510_v28  ;;  %v1969_v31 = vand.u32 4294901760, %v1524_v40 }
  0x5e   :  { %v1230_v3 = vpack.c.bf16 %v300_v18, %v293_v35  ;;  %v1298_v13 = vpack.c.bf16 %v1964_v29, %v1963_v1  ;;  %v1968_v35 = vand.u32 4294901760, %v1520_v38  ;;  %v1970_v32 = vand.u32 4294901760, %v1527_v43  ;;  %v1985_v29 = vld [vmem:[#allocation14_spill] sm:$0xff] }
  0x5f   :  { %v1300_v7 = vpack.c.bf16 %v1966_v59, %v1965_v52  ;;  %1239 = vmatpush3.bf16.msra.mxu0 %v1238_v33  ;;  %v1971_v15 = vand.u32 4294901760, %v1532_v46  ;;  %v1972_v21 = vand.u32 4294901760, %v1550_v58  ;;  %v1973_v25 = vand.u32 4294901760, %v1554_v63  ;;  %v1986_v59 = vld [vmem:[#allocation15_spill] sm:$0xff] }
  0x60   :  { %v1302_v18 = vpack.c.bf16 %v1968_v35, %v1967_v24  ;;  %v1304_v36 = vpack.c.bf16 %v1970_v32, %v1969_v31  ;;  %v1974_v26 = vand.u32 4294901760, %v1566_v12  ;;  %1231 = vmatpush3.bf16.msra.mxu1 %v1230_v3  ;;  %1241 = vmatprep.subr.bf16.mxu0 %v1240_v41  ;;  %v1975_v28 = vand.u32 4294901760, %v1570_v17  ;;  %v1987_v35 = vld [vmem:[#allocation16_spill] sm:$0xff] }
  0x61   :  { %v1306_v34 = vpack.c.bf16 %v1972_v21, %v1971_v15  ;;  %v1976_v38 = vand.u32 4294901760, %v1581_v42  ;;  %v1977_v43 = vand.u32 4294901760, %v1585_v50  ;;  %v1978_v24 = vand.u32 4294901760, %v1594_v60  ;;  %1265 = vmatprep.subr.bf16.mxu1 %v1493_v14 }
  0x62   :  { %v1308_v52 = vpack.c.bf16 %v1974_v26, %v1973_v25  ;;  %v1979_v58 = vand.u32 4294901760, %v1600_v5  ;;  %v1980_v33 = vand.u32 4294901760, %v1611_v30  ;;  %v1246_v12 = vpack.c.bf16 %v1581_v42, %v1570_v17 }
  0x63   :  { %v1310_v40 = vpack.c.bf16 %v1976_v38, %v1975_v28  ;;  %v1312_v46 = vpack.c.bf16 %v1978_v24, %v1977_v43  ;;  %417 = vmatmul.mubr.f32.vlgmr.msra.gmra.mrb[0].mxu1 %v1705_v37  ;;  %1243 = vmatpush3.bf16.msra.mxu0 %v1242_v23  ;;  %v1248_v41 = vpack.c.bf16 %v1594_v60, %v1585_v50  ;;  %v1981_v3 = vand.u32 4294901760, %v1708_v57  ;;  %v1982_v57 = vld [vmem:[#allocation12_spill] sm:$0xff]  ;;  %v1983_v23 = vld [vmem:[#allocation13_spill] sm:$0xff] }
  0x64   :  { %v1314_v63 = vpack.c.bf16 %v1980_v33, %v1979_v58  ;;  %1267 = vmatpush3.bf16.msra.mxu1 %v1497_v20  ;;  %1245 = vmatprep.subr.bf16.mxu0 %v1244_v47  ;;  %v1250_v1 = vpack.c.bf16 %v1611_v30, %v1600_v5  ;;  %v1252_v17 = vpack.c.bf16 %v1624_v55, %v1615_v51  ;;  %v1984_v47 = vld [vmem:[#allocation17_spill] sm:$0xff] }
  0x65   :  { %1269 = vmatprep.subr.bf16.mxu1 %v1501_v22  ;;  %659 = vmatprep.mubr.f32.mxu1 %v1981_v3  ;;  %v1254_v42 = vpack.c.bf16 %v1641_v56, %v1630_v61  ;;  %v1256_v50 = vpack.c.bf16 %v1654_v2, %v1645_v10  ;;  %v1258_v60 = vpack.c.bf16 %v1671_v19, %v1660_v53 }
  0x66   :  { %v1260_v5 = vpack.c.bf16 %v1684_v11, %v1675_v44  ;;  %v1262_v30 = vpack.c.bf16 %v1722_v54, %v1690_v8 }
  0x67   :  { %1247 = vmatpush3.bf16.msra.mxu0 %v1246_v12 }
  0x68   :  { %1271 = vmatpush3.bf16.msra.mxu1 %v1508_v27  ;;  %1249 = vmatprep.subr.bf16.mxu0 %v1248_v41 }
  0x69   :  { %1273 = vmatprep.subr.bf16.mxu1 %v1522_v39 }
  0x6b   :  { %1251 = vmatpush3.bf16.msra.mxu0 %v1250_v1 }
  0x6c   :  { %1275 = vmatpush3.bf16.msra.mxu1 %v1530_v45  ;;  %1253 = vmatprep.subr.bf16.mxu0 %v1252_v17 }
  0x6d   :  { %1277 = vmatprep.subr.bf16.mxu1 %v1552_v62 }
  0x6f   :  { %1255 = vmatpush3.bf16.msra.mxu0 %v1254_v42 }
  0x70   :  { %1279 = vmatpush3.bf16.msra.mxu1 %v1568_v16  ;;  %1257 = vmatprep.subr.bf16.mxu0 %v1256_v50 }
  0x71   :  { %1281 = vmatprep.subr.bf16.mxu1 %v1583_v49 }
  0x73   :  { %1259 = vmatpush3.bf16.msra.mxu0 %v1258_v60 }
  0x74   :  { %1283 = vmatpush3.bf16.msra.mxu1 %v1598_v4  ;;  %1261 = vmatprep.subr.bf16.mxu0 %v1260_v5 }
  0x75   :  { %1285 = vmatprep.subr.bf16.mxu1 %v1613_v48 }
  0x77   :  { %1263 = vmatpush3.bf16.msra.mxu0 %v1262_v30 }
  0x78   :  { %1287 = vmatpush3.bf16.msra.mxu1 %v1982_v57  ;;  %1297 = vmatprep.subr.bf16.mxu0 %v1296_v9  ;;  %v1989_v9 = vand.u32 4294901760, %v1624_v55 }
  0x79   :  { %1289 = vmatprep.subr.bf16.mxu1 %v1983_v23 }
  0x7a   :  { %555 = vmatmul.mubr.f32.vlgmr.msra.gmra.mrb[2].mxu0 %v1718_v0  ;;  %v1990_v0 = vand.u32 4294901760, %v1630_v61  ;;  %v1996_v61 = vand.u32 4294901760, %v1675_v44 }
  0x7b   :  { %1299 = vmatpush3.bf16.msra.mxu0 %v1298_v13  ;;  %829 = vmatprep.mubr.f32.mxu0 %v1984_v47 }
  0x7c   :  { %1291 = vmatpush3.bf16.msra.mxu1 %v1985_v29  ;;  %1301 = vmatprep.subr.bf16.mxu0 %v1300_v7  ;;  %v1988_v7 = vand.u32 4294901760, %v1615_v51  ;;  %v1994_v51 = vand.u32 4294901760, %v1660_v53 }
  0x7d   :  { %1293 = vmatprep.subr.bf16.mxu1 %v1986_v59 }
  0x7f   :  { %1303 = vmatpush3.bf16.msra.mxu0 %v1302_v18 }
  0x80   :  { %1295 = vmatpush3.bf16.msra.mxu1 %v1987_v35  ;;  %1305 = vmatprep.subr.bf16.mxu0 %v1304_v36 }
  0x81   :  { %1329 = vmatprep.subr.bf16.mxu1 %v1493_v14  ;;  %v1316_v14 = vpack.c.bf16 %v1989_v9, %v1988_v7 }
  0x83   :  { %663 = vmatmul.mubr.f32.vlgmr.msra.gmra.mrb[2].mxu1 %v182_v6  ;;  %1307 = vmatpush3.bf16.msra.mxu0 %v1306_v34 }
  0x84   :  { %1331 = vmatpush3.bf16.msra.mxu1 %v1497_v20  ;;  %1309 = vmatprep.subr.bf16.mxu0 %v1308_v52  ;;  %v1991_v20 = vand.u32 4294901760, %v1641_v56 }
  0x85   :  { %1333 = vmatprep.subr.bf16.mxu1 %v1501_v22  ;;  %933 = vmatprep.mubr.f32.mxu1 %v1984_v47  ;;  %v1992_v22 = vand.u32 4294901760, %v1645_v10  ;;  %v1998_v10 = vand.u32 4294901760, %v1690_v8 }
  0x86   :  { %v1318_v6 = vpack.c.bf16 %v1991_v20, %v1990_v0 }
  0x87   :  { %1311 = vmatpush3.bf16.msra.mxu0 %v1310_v40 }
  0x88   :  { %1335 = vmatpush3.bf16.msra.mxu1 %v1508_v27  ;;  %1313 = vmatprep.subr.bf16.mxu0 %v1312_v46  ;;  %v1993_v27 = vand.u32 4294901760, %v1654_v2 }
  0x89   :  { %1337 = vmatprep.subr.bf16.mxu1 %v1522_v39  ;;  %v1995_v39 = vand.u32 4294901760, %v1671_v19 }
  0x8a   :  { %v1320_v13 = vpack.c.bf16 %v1993_v27, %v1992_v22 }
  0x8b   :  { %1315 = vmatpush3.bf16.msra.mxu0 %v1314_v63  ;;  %v1322_v55 = vpack.c.bf16 %v1995_v39, %v1994_v51 }
  0x8c   :  { %1339 = vmatpush3.bf16.msra.mxu1 %v1530_v45  ;;  %1317 = vmatprep.subr.bf16.mxu0 %v1316_v14  ;;  %v1997_v45 = vand.u32 4294901760, %v1684_v11 }
  0x8d   :  { %1341 = vmatprep.subr.bf16.mxu1 %v1552_v62  ;;  %v1999_v62 = vand.u32 4294901760, %v1722_v54 }
  0x8e   :  { %v1324_v56 = vpack.c.bf16 %v1997_v45, %v1996_v61 }
  0x8f   :  { %1319 = vmatpush3.bf16.msra.mxu0 %v1318_v6  ;;  %v1326_v2 = vpack.c.bf16 %v1999_v62, %v1998_v10 }
  0x90   :  { %1343 = vmatpush3.bf16.msra.mxu1 %v1568_v16  ;;  %1321 = vmatprep.subr.bf16.mxu0 %v1320_v13 }
  0x91   :  { %1345 = vmatprep.subr.bf16.mxu1 %v1583_v49  ;;  %v77_v49 = vstv %s1906_s0  ;;  %s1441_s0 = smov [#allocation8]  }
  0x92   :  { %s948_s11 = sshll.u32 %s1441_s0, 4  ;;  %s949_s11 = int_to_ptr.vmem [resolvable:$true] %s948_s11 }
  0x93   :  { %1323 = vmatpush3.bf16.msra.mxu0 %v1322_v55  ;;  %s1409_s12 = scalar_lea.vmem %s949_s11, 128  ;;  %p1414_p3 = scmp.lt.s32.totalorder %s949_s11, %s949_s11 }
  0x94   :  { %1347 = vmatpush3.bf16.msra.mxu1 %v1598_v4  ;;  %1325 = vmatprep.subr.bf16.mxu0 %v1324_v56  ;;  %p1410_p2 = scmp.ne.s32.totalorder %s949_s11, %s1409_s12  ;;  %p1415_p4 = scmp.lt.s32.totalorder %s1409_s12, %s1409_s12 }
  0x95   :  { %1349 = vmatprep.subr.bf16.mxu1 %v1613_v48 }
  0x96   :  { %p1416_p5 = por %p1415_p4, %p1414_p3 }
  0x97   :  { %1327 = vmatpush3.bf16.msra.mxu0 %v1326_v2 }
  0x98   :  { %1351 = vmatpush3.bf16.msra.mxu1 %v1982_v57  ;;  %p1417_p6 = pnand %p1416_p5, %p1410_p2 }
  0x99   :  { %1353 = vmatprep.subr.bf16.mxu1 %v1983_v23 }
  0x9a   :  { %831 = vmatmul.mubr.f32.vlgmr.msra.gmra.mrb[4].mxu0 %v1705_v37 }
  0x9c   :  { %1355 = vmatpush3.bf16.msra.mxu1 %v1985_v29 }
  0x9d   :  { %1357 = vmatprep.subr.bf16.mxu1 %v1986_v59 }
  0xa0   :  { %1359 = vmatpush3.bf16.msra.mxu1 %v1987_v35 }
  0xa3   :  { %935 = vmatmul.mubr.f32.vlgmr.msra.gmra.mrb[4].mxu1 %v1705_v37 }
 0x12d   :  { %v990_v44 = vpop.f32.mrb[0].mxu0 }
 0x12e   :  { %v991_v53 = vpop.f32.mrb[1].mxu0 }
 0x12f   :  { %v992_v16 = vadd.f32 %v991_v53, %v990_v44 }
 0x131   :  { %v187_v4 = vadd.f32 %v992_v16, %v77_v49 }
 0x136   :  { %v1025_v48 = vpop.f32.mrb[0].mxu1 }
 0x137   :  { %v1026_v8 = vpop.f32.mrb[1].mxu1 }
 0x138   :  { %v1027_v19 = vadd.f32 %v1026_v8, %v1025_v48 }
 0x13a   :  { %v419_v11 = vadd.f32 %v1027_v19, %v187_v4 }
 0x14d   :  { %v1060_v54 = vpop.f32.mrb[2].mxu0 }
 0x14e   :  { %v1061_v18 = vpop.f32.mrb[3].mxu0 }
 0x14f   :  { %v1062_v31 = vadd.f32 %v1061_v18, %v1060_v54 }
 0x151   :  { %v557_v32 = vadd.f32 %v1062_v31, %v419_v11 }
 0x156   :  { %v1095_v36 = vpop.f32.mrb[2].mxu1 }
 0x157   :  { %v1096_v15 = vpop.f32.mrb[3].mxu1 }
 0x158   :  { %v1097_v21 = vadd.f32 %v1096_v15, %v1095_v36 }
 0x15a   :  { %v665_v37 = vadd.f32 %v1097_v21, %v557_v32 }
 0x16d   :  { %v1130_v34 = vpop.f32.mrb[4].mxu0 }
 0x16e   :  { %v1131_v25 = vpop.f32.mrb[5].mxu0 }
 0x16f   :  { %v1132_v26 = vadd.f32 %v1131_v25, %v1130_v34 }
 0x171   :  { %v833_v52 = vadd.f32 %v1132_v26, %v665_v37 }
 0x176   :  { %v1165_v28 = vpop.f32.mrb[4].mxu1 }
 0x177   :  { %v1166_v38 = vpop.f32.mrb[5].mxu1 }
 0x178   :  { %v1167_v40 = vadd.f32 %v1166_v38, %v1165_v28 }
 0x17a   :  { %v937_v43 = vadd.f32 %v1167_v40, %v833_v52 }
 0x17c   :  { %v940_v24 = vand.u32 2147483647, %v937_v43 }
 0x17e   :  { %941 = vst [vmem:[#allocation8] sm:$0xff] %v940_v24 }
 0x17f   :  { %1420 = shalt.err (!%p1417_p6)
}
 0x180   :  { %s1421_s15 = scalar_lea.hbm %s1909_s3, 128 }
 0x181   :  { %p1422_p7 = scmp.ne.s32.totalorder %s1909_s3, %s1421_s15  ;;  %p1425_p8 = scmp.lt.u32.totalorder %s1421_s15, %s1909_s3 }
 0x183   :  { %p1427_p9 = pnand %p1425_p8, %p1422_p7 }
 0x185   :  { %1430 = shalt.err (!%p1427_p9)
}
 0x186   :  { %951 = dma.vmem_to_hbm [thread:$0]  %s949_s11, 128, %s1909_s3, [#allocation5]  }
 0x187   :  { %1435 = dma.done.wait [#allocation5], 128  }
 0x188   :  { %1436 = vsyncadd [#allocation5], 4294967168 }
 0x189   :  { %955 = vsyncpa [#allocation4], 1 }
 0x18a   :  { %956 = vsyncpa [#allocation7], 1 }
 0x18b   :  { %957 = vsyncpa [#allocation5], 1 }

</bundles_post_ra>
